<compile_context>
chip_gen: v6e
topology: v6e:2x2x1
jax: 0.10.0
libtpu: 0.0.40
codegen_flags: <defaults>
</compile_context>

<pallas_src>
import jax
import jax.numpy as jnp
from jax.experimental import pallas as pl
from jax.experimental.pallas import tpu as pltpu


def rope_forward(x):
    """Production path: RoPE.forward is a pure identity — zero data movement."""
    return x


def _hbm_copy_kernel(x_hbm, o_hbm, sem):
    # Single HBM->HBM DMA of the whole (identically shaped) array.
    cp = pltpu.make_async_copy(x_hbm, o_hbm, sem)
    cp.start()
    cp.wait()


def rope_forward_pallas(x, *, donate=False):
    """Identity forward.

    donate=True  -> the caller gives up its input buffer; an aliased copy would
                    be 2x tensor size of wasted HBM traffic, so skip the kernel
                    entirely and return x (fastest possible identity).
    donate=False -> caller needs a separate materialized output buffer: issue a
                    single direct HBM->HBM DMA (no grid, no VMEM round trip).
    """
    if donate or x.size == 0:
        return x

    nbytes = x.size * jnp.dtype(x.dtype).itemsize
    return pl.pallas_call(
        _hbm_copy_kernel,
        out_shape=jax.ShapeDtypeStruct(x.shape, x.dtype),
        in_specs=[pl.BlockSpec(memory_space=pl.ANY)],
        out_specs=pl.BlockSpec(memory_space=pl.ANY),
        scratch_shapes=[pltpu.SemaphoreType.DMA],
        cost_estimate=pl.CostEstimate(
            flops=0, transcendentals=0, bytes_accessed=2 * nbytes
        ),
    )(x)


if __name__ == "__main__":
    key = jax.random.PRNGKey(0)
    k1, k2 = jax.random.split(key)

    # Attention-style input: batch=2, seq=8, head_dim=128, f32.
    x = jax.random.normal(k1, (2, 8, 128), dtype=jnp.float32)
    # Second case: bf16, odd seq, D < 128 (exercises non-(8,128)-friendly shape;
    # the whole-array HBM->HBM DMA handles it without masked partial stores).
    x2 = jax.random.normal(k2, (2, 13, 64), dtype=jnp.float32).astype(jnp.bfloat16)

    x_host = jax.device_get(x)
    x2_host = jax.device_get(x2)

    # Zero-cost production path.
    assert rope_forward(x) is x

    # Donated case: no kernel launch at all (per perf review).
    assert rope_forward_pallas(x, donate=True) is x

    # Materialized-output path: single HBM->HBM DMA copy. Input stays valid
    # (no aliasing / donation), so x itself is still usable afterwards.
    out = jax.block_until_ready(rope_forward_pallas(x))
    assert out.shape == x_host.shape and out.dtype == x_host.dtype
    assert bool((jax.device_get(out) == x_host).all())
    assert bool((jax.device_get(x) == x_host).all())  # input untouched

    out2 = jax.block_until_ready(rope_forward_pallas(x2))
    assert out2.shape == x2_host.shape and out2.dtype == x2_host.dtype
    assert bool((jax.device_get(out2) == x2_host).all())

    print("KERNEL_OK")
</pallas_src>

<mosaic_0001>
module attributes {stable_mosaic.version = 11 : i64} {
  func.func @_hbm_copy_kernel(%arg0: memref<2x8x128xf32, #tpu.memory_space<any>>, %arg1: memref<2x8x128xf32, #tpu.memory_space<any>>, %arg2: memref<!tpu.dma_semaphore, #tpu.memory_space<semaphore_mem>>) attributes {dimension_semantics = [], scalar_prefetch = 0 : i64, scratch_operands = 1 : i64, tpu.core_type = #tpu.core_type<tc>} {
    tpu.enqueue_dma source(%arg0 : memref<2x8x128xf32, #tpu.memory_space<any>>) target(%arg1 : memref<2x8x128xf32, #tpu.memory_space<any>>) target_semaphore(%arg2 : memref<!tpu.dma_semaphore, #tpu.memory_space<semaphore_mem>>)
    tpu.wait_dma2 semaphore(%arg2 : memref<!tpu.dma_semaphore, #tpu.memory_space<semaphore_mem>>) src(%arg0 : memref<2x8x128xf32, #tpu.memory_space<any>>) dst(%arg1 : memref<2x8x128xf32, #tpu.memory_space<any>>)
    return
  }
}

</mosaic_0001>

<bundles_post_ra>
// kernel: tpu_custom_call.1
= control target key start
LH: loop header
LB: loop body
LE: loop exit
PB: predicated region body
PF: predicated region fallthrough
CT: control target
= control target key end

     0   :  { %s29_s6 = smov [#allocation2]   ;;  %s30_s7 = smov 131072   ;;  %s48_s0 = inlined_call_operand.hbm [shape: f32[2,8,128], index: 0, kind: input, shape index: {}]   ;;  %s49_s1 = inlined_call_operand.hbm [shape: f32[2,8,128], index: 1, kind: output, shape index: {}]  }
   0x1   :  { %s31_s8 = smov 0  }
   0x2   :  { %12 = dma.general %s48_s0, 256, %s49_s1, %s29_s6, %s30_s7, [#allocation4], %s31_s8, 0  }
   0x3   :  { %27 = dma.done.wait [#allocation2], 256 }
   0x4   :  { %28 = vsyncadd [#allocation2], 4294967040 }
   0x5   :  { %17 = vsyncmov [#allocation2] }
   0x8   :  { %s18_s13 = vpop.sfrf %17 }
   0x9   :  { %p23_p0 = scmp.ne.s32.totalorder %s18_s13, 0 }
   0xb   :  { %22 = shalt.err (%p23_p0)  }

</bundles_post_ra>
